<compile_context>
chip_gen: v7x
topology: tpu7x:2x2x1
jax: 0.10.0
libtpu: 0.0.40
codegen_flags: <defaults>
</compile_context>

<pallas_src>
import functools

import jax
import jax.numpy as jnp
from jax import lax
from jax.experimental import pallas as pl
from jax.experimental.pallas import tpu as pltpu

LANES = 128
SUBLANES = 8
MAX_TILE_ROWS = 1024     # (1024, 128) f32 block = 512 KiB; 2x buffered = 1 MiB VMEM
MAX_CORE_SPLIT = 2       # leading "parallel" axis -> both TensorCores on v7x


def _restrict_loss_kernel(x_ref, acc_ref, *, n_valid, steps_per_core):
    """Accumulate lane-wise partials into a persistent (1, 4, 8, 128) VMEM block.

    acc_ref[0, 0] : per-lane sum of (x - 1)^2 over x > 1   (0.5 applied in wrapper)
    acc_ref[0, 1] : per-lane sum of x^2       over x < 0
    acc_ref[0, 2] : per-lane count of x > 1   (exact small integers in f32)
    acc_ref[0, 3] : per-lane count of x < 0
    """
    p = pl.program_id(0)
    i = pl.program_id(1)

    @pl.when(i == 0)
    def _init():
        acc_ref[...] = jnp.zeros_like(acc_ref)

    block_rows = x_ref.shape[0]
    block_elems = block_rows * LANES
    lb = p * steps_per_core + i               # logical block index (index_map may clamp)
    limit = n_valid - lb * block_elems        # number of valid elements in this block

    def fold(v):
        # (block_rows, 128) -> (8, 128): layout-preserving reshape + VPU adds only.
        return v.reshape(block_rows // SUBLANES, SUBLANES, LANES).sum(axis=0)

    def accumulate(x):
        # x is f32, already neutralised (0.5) where invalid.
        d1 = jnp.maximum(x - 1.0, 0.0)        # (x - 1) where x > 1 else 0
        d0 = jnp.maximum(-x, 0.0)             # (-x)    where x < 0 else 0
        acc_ref[0, 0] += fold(d1 * d1)
        acc_ref[0, 1] += fold(d0 * d0)
        acc_ref[0, 2] += fold((d1 > 0.0).astype(jnp.float32))
        acc_ref[0, 3] += fold((d0 > 0.0).astype(jnp.float32))

    @pl.when(limit >= block_elems)
    def _full_block():                        # fast path: no mask arithmetic
        accumulate(x_ref[...].astype(jnp.float32))

    @pl.when(jnp.logical_and(limit > 0, limit < block_elems))
    def _tail_block():                        # tail block: mask invalid elements
        x = x_ref[...].astype(jnp.float32)
        row_idx = lax.broadcasted_iota(jnp.int32, (block_rows, LANES), 0)
        lane_idx = lax.broadcasted_iota(jnp.int32, (block_rows, LANES), 1)
        valid = row_idx * LANES + lane_idx < limit
        accumulate(jnp.where(valid, x, 0.5))  # 0.5 is neutral: not > 1, not < 0
    # Blocks with limit <= 0 (clamped duplicates past the end) contribute nothing.


def _restrict_loss_impl(x):
    n = x.size
    flat = jnp.ravel(x)                       # native dtype; widening happens in-kernel

    # Reshape to a lane-dense (rows, 128) slab. Only pad (one extra HBM copy)
    # when the element count isn't already a multiple of 8*128 = 1024.
    chunk = SUBLANES * LANES
    n_padded = ((n + chunk - 1) // chunk) * chunk
    if n_padded != n:
        flat = jnp.pad(flat, (0, n_padded - n))   # padded tail is masked in-kernel
    rows = n_padded // LANES                      # always a multiple of 8
    slab = flat.reshape(rows, LANES)

    block_rows = min(MAX_TILE_ROWS, rows)         # multiple of 8, or == full dim
    total_blocks = -(-rows // block_rows)
    core_split = min(MAX_CORE_SPLIT, total_blocks)
    steps_per_core = -(-total_blocks // core_split)

    def in_index_map(p, i):
        # Clamp so a core's trailing (possibly empty) step re-reads the last
        # valid block; its contribution is masked out in-kernel (limit <= 0).
        return (jnp.minimum(p * steps_per_core + i, total_blocks - 1), 0)

    kernel = functools.partial(
        _restrict_loss_kernel, n_valid=n, steps_per_core=steps_per_core)

    partials = pl.pallas_call(
        kernel,
        out_shape=jax.ShapeDtypeStruct((core_split, 4, SUBLANES, LANES), jnp.float32),
        grid=(core_split, steps_per_core),
        in_specs=[pl.BlockSpec((block_rows, LANES), in_index_map)],
        out_specs=pl.BlockSpec((1, 4, SUBLANES, LANES), lambda p, i: (p, 0, 0, 0)),
        compiler_params=pltpu.CompilerParams(
            dimension_semantics=("parallel", "arbitrary")),
    )(slab)

    # Tiny epilogue in XLA: cross-lane reductions + torch-style divisor clamping.
    sum_one = 0.5 * jnp.sum(partials[:, 0])
    sum_zero = 0.5 * jnp.sum(partials[:, 1])
    count1 = jnp.sum(partials[:, 2].astype(jnp.int32))   # per-lane counts are exact ints
    count0 = jnp.sum(partials[:, 3].astype(jnp.int32))
    count1 = jnp.where(count1 == 0, 1, count1).astype(jnp.float32)
    count0 = jnp.where(count0 == 0, 1, count0).astype(jnp.float32)
    return sum_one / count1 + sum_zero / count0


restrict_loss = jax.jit(_restrict_loss_impl)


def _reference_loss(x):
    """Pure-JAX reference mirroring the PyTorch forward exactly."""
    x = x.astype(jnp.float32)
    count1 = jnp.sum(x > 1).astype(jnp.float32)
    count0 = jnp.sum(x < 0).astype(jnp.float32)
    count1 = jnp.where(count1 == 0, 1.0, count1)
    count0 = jnp.where(count0 == 0, 1.0, count0)
    diff_one = jnp.where(x <= 1, 1.0, x) - 1.0
    diff_zero = 0.0 - jnp.where(x >= 0, 0.0, x)
    return jnp.sum(0.5 * diff_one**2) / count1 + jnp.sum(0.5 * diff_zero**2) / count0


if __name__ == "__main__":
    key = jax.random.PRNGKey(0)

    # Primary small NCHW input (fast aligned path, single block).
    x = jax.random.normal(key, (2, 4, 16, 16), dtype=jnp.float32) * 1.5 + 0.5
    loss = jax.block_until_ready(restrict_loss(x))
    ref = _reference_loss(x)
    assert jnp.allclose(loss, ref, rtol=1e-5, atol=1e-6), (loss, ref)

    # Misaligned size: exercises the in-kernel tail mask.
    k1, k2 = jax.random.split(key)
    x2 = jax.random.normal(k1, (3, 3, 37, 41), dtype=jnp.float32) * 1.5 + 0.5
    loss2 = jax.block_until_ready(restrict_loss(x2))
    ref2 = _reference_loss(x2)
    assert jnp.allclose(loss2, ref2, rtol=1e-5, atol=1e-6), (loss2, ref2)

    # Multi-block + 2-way core split (odd block count exercises the clamp path).
    x3 = jax.random.normal(k2, (2, 3, 256, 256), dtype=jnp.float32) * 1.5 + 0.5
    loss3 = jax.block_until_ready(restrict_loss(x3))
    ref3 = _reference_loss(x3)
    assert jnp.allclose(loss3, ref3, rtol=1e-5, atol=1e-6), (loss3, ref3)

    print("KERNEL_OK")
</pallas_src>

<mosaic_0001>
module attributes {stable_mosaic.version = 11 : i64} {
  func.func @_restrict_loss_kernel(%arg0: i32, %arg1: i32, %arg2: memref<16x128xf32, #tpu.memory_space<vmem>>, %arg3: memref<1x4x8x128xf32, #tpu.memory_space<vmem>>) attributes {dimension_semantics = [#tpu.dimension_semantics<parallel>, #tpu.dimension_semantics<arbitrary>], iteration_bounds = array<i64: 1, 1>, scalar_prefetch = 0 : i64, scratch_operands = 0 : i64, tpu.core_type = #tpu.core_type<tc>, window_params = [{transform_indices = @transform_0, window_bounds = array<i64: 16, 128>}, {transform_indices = @transform_1, window_bounds = array<i64: 1, 4, 8, 128>}]} {
    %c0_i32 = arith.constant 0 : i32
    %0 = arith.cmpi eq, %arg1, %c0_i32 : i32
    %1 = arith.extui %0 : i1 to i32
    %c0_i32_0 = arith.constant 0 : i32
    %2 = arith.cmpi ne, %1, %c0_i32_0 : i32
    scf.if %2 {
      %cst = arith.constant 0.000000e+00 : f32
      %15 = vector.broadcast %cst : f32 to vector<1x4x8x128xf32>
      %c0 = arith.constant 0 : index
      %c0_7 = arith.constant 0 : index
      %c0_8 = arith.constant 0 : index
      %c0_9 = arith.constant 0 : index
      %16 = vector.load %arg3[%c0, %c0_7, %c0_8, %c0_9] : memref<1x4x8x128xf32, #tpu.memory_space<vmem>>, vector<1x4x8x128xf32>
      tpu.vector_store %arg3[%c0, %c0_7, %c0_8, %c0_9], %15 {strides = array<i32>} : memref<1x4x8x128xf32, #tpu.memory_space<vmem>>, vector<1x4x8x128xf32>,
    } else {
    }
    %c1_i32 = arith.constant 1 : i32
    %3 = arith.muli %arg0, %c1_i32 : i32
    %4 = arith.addi %3, %arg1 : i32
    %c2048_i32 = arith.constant 2048 : i32
    %5 = arith.muli %4, %c2048_i32 : i32
    %c2048_i32_1 = arith.constant 2048 : i32
    %6 = arith.subi %c2048_i32_1, %5 : i32
    %c2048_i32_2 = arith.constant 2048 : i32
    %7 = arith.cmpi sge, %6, %c2048_i32_2 : i32
    %8 = arith.extui %7 : i1 to i32
    %c0_i32_3 = arith.constant 0 : i32
    %9 = arith.cmpi ne, %8, %c0_i32_3 : i32
    scf.if %9 {
      %c0 = arith.constant 0 : index
      %c0_7 = arith.constant 0 : index
      %15 = vector.load %arg2[%c0, %c0_7] : memref<16x128xf32, #tpu.memory_space<vmem>>, vector<16x128xf32>
      %cst = arith.constant 1.000000e+00 : f32
      %16 = vector.broadcast %cst : f32 to vector<16x128xf32>
      %17 = arith.subf %15, %16 : vector<16x128xf32>
      %cst_8 = arith.constant 0.000000e+00 : f32
      %18 = vector.broadcast %cst_8 : f32 to vector<16x128xf32>
      %19 = arith.maximumf %17, %18 : vector<16x128xf32>
      %cst_9 = arith.constant 0.000000e+00 : f32
      %20 = vector.broadcast %cst_9 : f32 to vector<16x128xf32>
      %21 = arith.subf %20, %15 : vector<16x128xf32>
      %cst_10 = arith.constant 0.000000e+00 : f32
      %22 = vector.broadcast %cst_10 : f32 to vector<16x128xf32>
      %23 = arith.maximumf %21, %22 : vector<16x128xf32>
      %c0_11 = arith.constant 0 : index
      %c0_12 = arith.constant 0 : index
      %c0_13 = arith.constant 0 : index
      %c0_14 = arith.constant 0 : index
      %24 = vector.load %arg3[%c0_11, %c0_12, %c0_13, %c0_14] : memref<1x4x8x128xf32, #tpu.memory_space<vmem>>, vector<1x1x8x128xf32>
      %25 = vector.shape_cast %24 : vector<1x1x8x128xf32> to vector<8x128xf32>
      %26 = arith.mulf %19, %19 : vector<16x128xf32>
      %27 = vector.shape_cast %26 : vector<16x128xf32> to vector<2x8x128xf32>
      %cst_15 = arith.constant dense<0.000000e+00> : vector<8x128xf32>
      %28 = vector.multi_reduction <add>, %27, %cst_15 [0] : vector<2x8x128xf32> to vector<8x128xf32>
      %29 = arith.addf %25, %28 : vector<8x128xf32>
      %c0_16 = arith.constant 0 : index
      %c0_17 = arith.constant 0 : index
      %c0_18 = arith.constant 0 : index
      %c0_19 = arith.constant 0 : index
      %30 = vector.load %arg3[%c0_16, %c0_17, %c0_18, %c0_19] : memref<1x4x8x128xf32, #tpu.memory_space<vmem>>, vector<1x1x8x128xf32>
      %31 = vector.shape_cast %30 : vector<1x1x8x128xf32> to vector<8x128xf32>
      %32 = vector.shape_cast %29 : vector<8x128xf32> to vector<1x1x8x128xf32>
      tpu.vector_store %arg3[%c0_16, %c0_17, %c0_18, %c0_19], %32 {strides = array<i32>} : memref<1x4x8x128xf32, #tpu.memory_space<vmem>>, vector<1x1x8x128xf32>,
      %c0_20 = arith.constant 0 : index
      %c1 = arith.constant 1 : index
      %c0_21 = arith.constant 0 : index
      %c0_22 = arith.constant 0 : index
      %33 = vector.load %arg3[%c0_20, %c1, %c0_21, %c0_22] : memref<1x4x8x128xf32, #tpu.memory_space<vmem>>, vector<1x1x8x128xf32>
      %34 = vector.shape_cast %33 : vector<1x1x8x128xf32> to vector<8x128xf32>
      %35 = arith.mulf %23, %23 : vector<16x128xf32>
      %36 = vector.shape_cast %35 : vector<16x128xf32> to vector<2x8x128xf32>
      %cst_23 = arith.constant dense<0.000000e+00> : vector<8x128xf32>
      %37 = vector.multi_reduction <add>, %36, %cst_23 [0] : vector<2x8x128xf32> to vector<8x128xf32>
      %38 = arith.addf %34, %37 : vector<8x128xf32>
      %c0_24 = arith.constant 0 : index
      %c1_25 = arith.constant 1 : index
      %c0_26 = arith.constant 0 : index
      %c0_27 = arith.constant 0 : index
      %39 = vector.load %arg3[%c0_24, %c1_25, %c0_26, %c0_27] : memref<1x4x8x128xf32, #tpu.memory_space<vmem>>, vector<1x1x8x128xf32>
      %40 = vector.shape_cast %39 : vector<1x1x8x128xf32> to vector<8x128xf32>
      %41 = vector.shape_cast %38 : vector<8x128xf32> to vector<1x1x8x128xf32>
      tpu.vector_store %arg3[%c0_24, %c1_25, %c0_26, %c0_27], %41 {strides = array<i32>} : memref<1x4x8x128xf32, #tpu.memory_space<vmem>>, vector<1x1x8x128xf32>,
      %c0_28 = arith.constant 0 : index
      %c2 = arith.constant 2 : index
      %c0_29 = arith.constant 0 : index
      %c0_30 = arith.constant 0 : index
      %42 = vector.load %arg3[%c0_28, %c2, %c0_29, %c0_30] : memref<1x4x8x128xf32, #tpu.memory_space<vmem>>, vector<1x1x8x128xf32>
      %43 = vector.shape_cast %42 : vector<1x1x8x128xf32> to vector<8x128xf32>
      %cst_31 = arith.constant 0.000000e+00 : f32
      %44 = vector.broadcast %cst_31 : f32 to vector<16x128xf32>
      %45 = arith.cmpf ogt, %19, %44 : vector<16x128xf32>
      %46 = arith.extui %45 : vector<16x128xi1> to vector<16x128xi32>
      %47 = arith.sitofp %46 : vector<16x128xi32> to vector<16x128xf32>
      %48 = vector.shape_cast %47 : vector<16x128xf32> to vector<2x8x128xf32>
      %cst_32 = arith.constant dense<0.000000e+00> : vector<8x128xf32>
      %49 = vector.multi_reduction <add>, %48, %cst_32 [0] : vector<2x8x128xf32> to vector<8x128xf32>
      %50 = arith.addf %43, %49 : vector<8x128xf32>
      %c0_33 = arith.constant 0 : index
      %c2_34 = arith.constant 2 : index
      %c0_35 = arith.constant 0 : index
      %c0_36 = arith.constant 0 : index
      %51 = vector.load %arg3[%c0_33, %c2_34, %c0_35, %c0_36] : memref<1x4x8x128xf32, #tpu.memory_space<vmem>>, vector<1x1x8x128xf32>
      %52 = vector.shape_cast %51 : vector<1x1x8x128xf32> to vector<8x128xf32>
      %53 = vector.shape_cast %50 : vector<8x128xf32> to vector<1x1x8x128xf32>
      tpu.vector_store %arg3[%c0_33, %c2_34, %c0_35, %c0_36], %53 {strides = array<i32>} : memref<1x4x8x128xf32, #tpu.memory_space<vmem>>, vector<1x1x8x128xf32>,
      %c0_37 = arith.constant 0 : index
      %c3 = arith.constant 3 : index
      %c0_38 = arith.constant 0 : index
      %c0_39 = arith.constant 0 : index
      %54 = vector.load %arg3[%c0_37, %c3, %c0_38, %c0_39] : memref<1x4x8x128xf32, #tpu.memory_space<vmem>>, vector<1x1x8x128xf32>
      %55 = vector.shape_cast %54 : vector<1x1x8x128xf32> to vector<8x128xf32>
      %cst_40 = arith.constant 0.000000e+00 : f32
      %56 = vector.broadcast %cst_40 : f32 to vector<16x128xf32>
      %57 = arith.cmpf ogt, %23, %56 : vector<16x128xf32>
      %58 = arith.extui %57 : vector<16x128xi1> to vector<16x128xi32>
      %59 = arith.sitofp %58 : vector<16x128xi32> to vector<16x128xf32>
      %60 = vector.shape_cast %59 : vector<16x128xf32> to vector<2x8x128xf32>
      %cst_41 = arith.constant dense<0.000000e+00> : vector<8x128xf32>
      %61 = vector.multi_reduction <add>, %60, %cst_41 [0] : vector<2x8x128xf32> to vector<8x128xf32>
      %62 = arith.addf %55, %61 : vector<8x128xf32>
      %c0_42 = arith.constant 0 : index
      %c3_43 = arith.constant 3 : index
      %c0_44 = arith.constant 0 : index
      %c0_45 = arith.constant 0 : index
      %63 = vector.load %arg3[%c0_42, %c3_43, %c0_44, %c0_45] : memref<1x4x8x128xf32, #tpu.memory_space<vmem>>, vector<1x1x8x128xf32>
      %64 = vector.shape_cast %63 : vector<1x1x8x128xf32> to vector<8x128xf32>
      %65 = vector.shape_cast %62 : vector<8x128xf32> to vector<1x1x8x128xf32>
      tpu.vector_store %arg3[%c0_42, %c3_43, %c0_44, %c0_45], %65 {strides = array<i32>} : memref<1x4x8x128xf32, #tpu.memory_space<vmem>>, vector<1x1x8x128xf32>,
    } else {
    }
    %c0_i32_4 = arith.constant 0 : i32
    %10 = arith.cmpi sgt, %6, %c0_i32_4 : i32
    %c2048_i32_5 = arith.constant 2048 : i32
    %11 = arith.cmpi slt, %6, %c2048_i32_5 : i32
    %12 = arith.andi %10, %11 : i1
    %13 = arith.extui %12 : i1 to i32
    %c0_i32_6 = arith.constant 0 : i32
    %14 = arith.cmpi ne, %13, %c0_i32_6 : i32
    scf.if %14 {
      %c0 = arith.constant 0 : index
      %c0_7 = arith.constant 0 : index
      %15 = vector.load %arg2[%c0, %c0_7] : memref<16x128xf32, #tpu.memory_space<vmem>>, vector<16x128xf32>
      %16 = tpu.iota {dimensions = array<i32: 0>} : vector<16x128xi32>
      %17 = tpu.iota {dimensions = array<i32: 1>} : vector<16x128xi32>
      %c128_i32 = arith.constant 128 : i32
      %18 = vector.broadcast %c128_i32 : i32 to vector<16x128xi32>
      %19 = arith.muli %16, %18 : vector<16x128xi32>
      %20 = arith.addi %19, %17 : vector<16x128xi32>
      %21 = vector.broadcast %6 : i32 to vector<16x128xi32>
      %22 = arith.cmpi slt, %20, %21 : vector<16x128xi32>
      %cst = arith.constant 5.000000e-01 : f32
      %23 = vector.broadcast %cst : f32 to vector<16x128xf32>
      %24 = arith.select %22, %15, %23 : vector<16x128xi1>, vector<16x128xf32>
      %cst_8 = arith.constant 1.000000e+00 : f32
      %25 = vector.broadcast %cst_8 : f32 to vector<16x128xf32>
      %26 = arith.subf %24, %25 : vector<16x128xf32>
      %cst_9 = arith.constant 0.000000e+00 : f32
      %27 = vector.broadcast %cst_9 : f32 to vector<16x128xf32>
      %28 = arith.maximumf %26, %27 : vector<16x128xf32>
      %cst_10 = arith.constant 0.000000e+00 : f32
      %29 = vector.broadcast %cst_10 : f32 to vector<16x128xf32>
      %30 = arith.subf %29, %24 : vector<16x128xf32>
      %cst_11 = arith.constant 0.000000e+00 : f32
      %31 = vector.broadcast %cst_11 : f32 to vector<16x128xf32>
      %32 = arith.maximumf %30, %31 : vector<16x128xf32>
      %c0_12 = arith.constant 0 : index
      %c0_13 = arith.constant 0 : index
      %c0_14 = arith.constant 0 : index
      %c0_15 = arith.constant 0 : index
      %33 = vector.load %arg3[%c0_12, %c0_13, %c0_14, %c0_15] : memref<1x4x8x128xf32, #tpu.memory_space<vmem>>, vector<1x1x8x128xf32>
      %34 = vector.shape_cast %33 : vector<1x1x8x128xf32> to vector<8x128xf32>
      %35 = arith.mulf %28, %28 : vector<16x128xf32>
      %36 = vector.shape_cast %35 : vector<16x128xf32> to vector<2x8x128xf32>
      %cst_16 = arith.constant dense<0.000000e+00> : vector<8x128xf32>
      %37 = vector.multi_reduction <add>, %36, %cst_16 [0] : vector<2x8x128xf32> to vector<8x128xf32>
      %38 = arith.addf %34, %37 : vector<8x128xf32>
      %c0_17 = arith.constant 0 : index
      %c0_18 = arith.constant 0 : index
      %c0_19 = arith.constant 0 : index
      %c0_20 = arith.constant 0 : index
      %39 = vector.load %arg3[%c0_17, %c0_18, %c0_19, %c0_20] : memref<1x4x8x128xf32, #tpu.memory_space<vmem>>, vector<1x1x8x128xf32>
      %40 = vector.shape_cast %39 : vector<1x1x8x128xf32> to vector<8x128xf32>
      %41 = vector.shape_cast %38 : vector<8x128xf32> to vector<1x1x8x128xf32>
      tpu.vector_store %arg3[%c0_17, %c0_18, %c0_19, %c0_20], %41 {strides = array<i32>} : memref<1x4x8x128xf32, #tpu.memory_space<vmem>>, vector<1x1x8x128xf32>,
      %c0_21 = arith.constant 0 : index
      %c1 = arith.constant 1 : index
      %c0_22 = arith.constant 0 : index
      %c0_23 = arith.constant 0 : index
      %42 = vector.load %arg3[%c0_21, %c1, %c0_22, %c0_23] : memref<1x4x8x128xf32, #tpu.memory_space<vmem>>, vector<1x1x8x128xf32>
      %43 = vector.shape_cast %42 : vector<1x1x8x128xf32> to vector<8x128xf32>
      %44 = arith.mulf %32, %32 : vector<16x128xf32>
      %45 = vector.shape_cast %44 : vector<16x128xf32> to vector<2x8x128xf32>
      %cst_24 = arith.constant dense<0.000000e+00> : vector<8x128xf32>
      %46 = vector.multi_reduction <add>, %45, %cst_24 [0] : vector<2x8x128xf32> to vector<8x128xf32>
      %47 = arith.addf %43, %46 : vector<8x128xf32>
      %c0_25 = arith.constant 0 : index
      %c1_26 = arith.constant 1 : index
      %c0_27 = arith.constant 0 : index
      %c0_28 = arith.constant 0 : index
      %48 = vector.load %arg3[%c0_25, %c1_26, %c0_27, %c0_28] : memref<1x4x8x128xf32, #tpu.memory_space<vmem>>, vector<1x1x8x128xf32>
      %49 = vector.shape_cast %48 : vector<1x1x8x128xf32> to vector<8x128xf32>
      %50 = vector.shape_cast %47 : vector<8x128xf32> to vector<1x1x8x128xf32>
      tpu.vector_store %arg3[%c0_25, %c1_26, %c0_27, %c0_28], %50 {strides = array<i32>} : memref<1x4x8x128xf32, #tpu.memory_space<vmem>>, vector<1x1x8x128xf32>,
      %c0_29 = arith.constant 0 : index
      %c2 = arith.constant 2 : index
      %c0_30 = arith.constant 0 : index
      %c0_31 = arith.constant 0 : index
      %51 = vector.load %arg3[%c0_29, %c2, %c0_30, %c0_31] : memref<1x4x8x128xf32, #tpu.memory_space<vmem>>, vector<1x1x8x128xf32>
      %52 = vector.shape_cast %51 : vector<1x1x8x128xf32> to vector<8x128xf32>
      %cst_32 = arith.constant 0.000000e+00 : f32
      %53 = vector.broadcast %cst_32 : f32 to vector<16x128xf32>
      %54 = arith.cmpf ogt, %28, %53 : vector<16x128xf32>
      %55 = arith.extui %54 : vector<16x128xi1> to vector<16x128xi32>
      %56 = arith.sitofp %55 : vector<16x128xi32> to vector<16x128xf32>
      %57 = vector.shape_cast %56 : vector<16x128xf32> to vector<2x8x128xf32>
      %cst_33 = arith.constant dense<0.000000e+00> : vector<8x128xf32>
      %58 = vector.multi_reduction <add>, %57, %cst_33 [0] : vector<2x8x128xf32> to vector<8x128xf32>
      %59 = arith.addf %52, %58 : vector<8x128xf32>
      %c0_34 = arith.constant 0 : index
      %c2_35 = arith.constant 2 : index
      %c0_36 = arith.constant 0 : index
      %c0_37 = arith.constant 0 : index
      %60 = vector.load %arg3[%c0_34, %c2_35, %c0_36, %c0_37] : memref<1x4x8x128xf32, #tpu.memory_space<vmem>>, vector<1x1x8x128xf32>
      %61 = vector.shape_cast %60 : vector<1x1x8x128xf32> to vector<8x128xf32>
      %62 = vector.shape_cast %59 : vector<8x128xf32> to vector<1x1x8x128xf32>
      tpu.vector_store %arg3[%c0_34, %c2_35, %c0_36, %c0_37], %62 {strides = array<i32>} : memref<1x4x8x128xf32, #tpu.memory_space<vmem>>, vector<1x1x8x128xf32>,
      %c0_38 = arith.constant 0 : index
      %c3 = arith.constant 3 : index
      %c0_39 = arith.constant 0 : index
      %c0_40 = arith.constant 0 : index
      %63 = vector.load %arg3[%c0_38, %c3, %c0_39, %c0_40] : memref<1x4x8x128xf32, #tpu.memory_space<vmem>>, vector<1x1x8x128xf32>
      %64 = vector.shape_cast %63 : vector<1x1x8x128xf32> to vector<8x128xf32>
      %cst_41 = arith.constant 0.000000e+00 : f32
      %65 = vector.broadcast %cst_41 : f32 to vector<16x128xf32>
      %66 = arith.cmpf ogt, %32, %65 : vector<16x128xf32>
      %67 = arith.extui %66 : vector<16x128xi1> to vector<16x128xi32>
      %68 = arith.sitofp %67 : vector<16x128xi32> to vector<16x128xf32>
      %69 = vector.shape_cast %68 : vector<16x128xf32> to vector<2x8x128xf32>
      %cst_42 = arith.constant dense<0.000000e+00> : vector<8x128xf32>
      %70 = vector.multi_reduction <add>, %69, %cst_42 [0] : vector<2x8x128xf32> to vector<8x128xf32>
      %71 = arith.addf %64, %70 : vector<8x128xf32>
      %c0_43 = arith.constant 0 : index
      %c3_44 = arith.constant 3 : index
      %c0_45 = arith.constant 0 : index
      %c0_46 = arith.constant 0 : index
      %72 = vector.load %arg3[%c0_43, %c3_44, %c0_45, %c0_46] : memref<1x4x8x128xf32, #tpu.memory_space<vmem>>, vector<1x1x8x128xf32>
      %73 = vector.shape_cast %72 : vector<1x1x8x128xf32> to vector<8x128xf32>
      %74 = vector.shape_cast %71 : vector<8x128xf32> to vector<1x1x8x128xf32>
      tpu.vector_store %arg3[%c0_43, %c3_44, %c0_45, %c0_46], %74 {strides = array<i32>} : memref<1x4x8x128xf32, #tpu.memory_space<vmem>>, vector<1x1x8x128xf32>,
    } else {
    }
    return
  }
  func.func @transform_0(%arg0: i32, %arg1: i32) -> (i32, i32) {
    %c1_i32 = arith.constant 1 : i32
    %0 = arith.muli %arg0, %c1_i32 : i32
    %1 = arith.addi %0, %arg1 : i32
    %c0_i32 = arith.constant 0 : i32
    %2 = arith.minsi %1, %c0_i32 : i32
    %c0_i32_0 = arith.constant 0 : i32
    %c0_i32_1 = arith.constant 0 : i32
    return %2, %c0_i32_0 : i32, i32
  }
  func.func @transform_1(%arg0: i32, %arg1: i32) -> (i32, i32, i32, i32) {
    %c0_i32 = arith.constant 0 : i32
    %c0_i32_0 = arith.constant 0 : i32
    %c0_i32_1 = arith.constant 0 : i32
    %c0_i32_2 = arith.constant 0 : i32
    return %arg0, %c0_i32, %c0_i32_0, %c0_i32_1 : i32, i32, i32, i32
  }
}

</mosaic_0001>

<bundles_post_ra>
// kernel: _restrict_loss_impl.1
= control target key start
LH: loop header
LB: loop body
LE: loop exit
PB: predicated region body
PF: predicated region fallthrough
CT: control target
= control target key end

     0   :  { %v200_v16 = vmov 0.0   ;;  %s229_s0 = inlined_call_operand.vmem [shape: f32[16,128], index: 0, kind: input, shape index: {}]   ;;  %s230_s1 = inlined_call_operand.vmem [shape: f32[1,4,8,128], index: 1, kind: output, shape index: {}]  }
   0x1   :  { %v55_v0 = vld [vmem:[%s229_s0] sm:$0xff]  ;;  %v56_v1 = vld [vmem:[%s229_s0 + $0x8] sm:$0xff] }
   0x2   :  { %v175_v2 = vadd.f32 -1.0, %v55_v0  ;;  %v176_v3 = vadd.f32 -1.0, %v56_v1  ;;  %v61_v4 = vsub.f32 0.0, %v55_v0  ;;  %v62_v5 = vsub.f32 0.0, %v56_v1 }
   0x4   :  { %v59_v6 = vmax.f32 %v175_v2, 0.0  ;;  %v60_v7 = vmax.f32 %v176_v3, 0.0  ;;  %v63_v8 = vmax.f32 %v61_v4, 0.0  ;;  %v64_v9 = vmax.f32 %v62_v5, 0.0 }
   0x6   :  { %v66_v10 = vmul.f32 %v59_v6, %v59_v6  ;;  %v67_v11 = vmul.f32 %v60_v7, %v60_v7  ;;  %v73_v12 = vmul.f32 %v63_v8, %v63_v8  ;;  %v74_v13 = vmul.f32 %v64_v9, %v64_v9 }
   0x7   :  { %vm80_vm0 = vcmp.gt.f32.partialorder %v59_v6, 0.0  ;;  %vm81_vm1 = vcmp.gt.f32.partialorder %v60_v7, 0.0  ;;  %vm91_vm2 = vcmp.gt.f32.partialorder %v63_v8, 0.0  ;;  %vm92_vm3 = vcmp.gt.f32.partialorder %v64_v9, 0.0 }
   0x8   :  { %v68_v14 = vadd.f32 %v67_v11, %v66_v10  ;;  %v75_v15 = vadd.f32 %v74_v13, %v73_v12  ;;  %v180_v17 = vsel %vm80_vm0, 1.0, %v200_v16  ;;  %v181_v18 = vsel %vm81_vm1, 1.0, %v200_v16 }
   0x9   :  { %v86_v19 = vadd.f32 %v181_v18, %v180_v17  ;;  %v184_v20 = vsel %vm91_vm2, 1.0, %v200_v16  ;;  %v185_v21 = vsel %vm92_vm3, 1.0, %v200_v16 }
   0xa   :  { %v97_v22 = vadd.f32 %v185_v21, %v184_v20  ;;  %70 = vst [vmem:[%s230_s1] sm:$0xff] %v68_v14  ;;  %178 = vst [vmem:[%s230_s1 + $0x8] sm:$0xff] %v75_v15 }
   0xb   :  { %182 = vst [vmem:[%s230_s1 + $0x10] sm:$0xff] %v86_v19 }
   0xc   :  { %186 = vst [vmem:[%s230_s1 + $0x18] sm:$0xff] %v97_v22 }

</bundles_post_ra>
